<compile_context>
chip_gen: v5e
topology: v5e:2x2
jax: 0.10.0
libtpu: 0.0.40
codegen_flags: <defaults>
</compile_context>

<pallas_src>
import functools

import jax
import jax.numpy as jnp
from jax.experimental import pallas as pl
from jax.experimental.pallas import tpu as pltpu

ALPHA = 2  # fixed by the reference implementation (powers hard-coded below)
BETA = 4


# ----------------------------------------------------------------------------
# Kernel 1: heatmap variant focal loss (tiled reduction, per-core partials)
# ----------------------------------------------------------------------------
def _focal_kernel(pred_ref, target_ref, out_ref, loss_acc, npos_acc, *,
                  tile_rows):
    i = pl.program_id(1)  # "arbitrary" reduction axis (axis 0 = core split)

    @pl.when(i == 0)
    def _init():
        loss_acc[...] = jnp.zeros_like(loss_acc)
        npos_acc[...] = jnp.zeros_like(npos_acc)

    p = pred_ref[...].astype(jnp.float32)     # [tile_rows, 128]
    t = target_ref[...].astype(jnp.float32)

    p = jnp.maximum(p, 1e-12)                 # torch.clamp(pred, 1e-12)
    one_m_p = 1.0 - p
    log_p = jnp.log(p)
    # Guarded vs. torch (which gives -inf if pred saturates to exactly 1.0).
    log_1mp = jnp.log(jnp.maximum(one_m_p, 1e-12))
    one_m_t = 1.0 - t
    one_m_t2 = one_m_t * one_m_t

    pos = (t == 1.0)
    pos_term = one_m_p * one_m_p * log_p                      # (1-p)^ALPHA*log p
    neg_term = one_m_t2 * one_m_t2 * (p * p) * log_1mp        # (1-t)^BETA*p^ALPHA*log(1-p)
    # Single fused per-element term; t >= 1 and t != 1 (sentinel pad) -> 0.
    loss_elem = jnp.where(pos, pos_term,
                          jnp.where(t < 1.0, neg_term, 0.0))

    nsub = tile_rows // 8
    loss_acc[...] += jnp.sum(loss_elem.reshape(nsub, 8, 128), axis=0)
    npos_acc[...] += jnp.sum(pos.astype(jnp.float32).reshape(nsub, 8, 128),
                             axis=0)

    @pl.when(i == pl.num_programs(1) - 1)
    def _finalize():
        loss_sum = jnp.sum(loss_acc[...])
        num_pos = jnp.sum(npos_acc[...])
        sub = jax.lax.broadcasted_iota(jnp.int32, (1, 8, 128), 1)
        lane = jax.lax.broadcasted_iota(jnp.int32, (1, 8, 128), 2)
        first = sub == 0
        out_ref[...] = jnp.where(first & (lane == 0), loss_sum,
                                 jnp.where(first & (lane == 1), num_pos, 0.0))


def heatmap_variant_focal_loss(pred, target, *, tile_rows_max=4096):
    """pred, target: [B, C, H, W] float (any float dtype). Returns scalar f32."""
    n = pred.size
    p = pred.reshape(-1)          # keep native dtype (bf16 passes through)
    t = target.reshape(-1)

    rows0 = pl.cdiv(n, 128)
    tile_rows = min(tile_rows_max, ((rows0 + 7) // 8) * 8)
    num_tiles = pl.cdiv(rows0, tile_rows)
    # 2-way core split (helps v7x megacore; harmless single-core).
    n_split = 2 if num_tiles >= 2 else 1
    steps = pl.cdiv(num_tiles, n_split)
    rows = n_split * steps * tile_rows
    pad = rows * 128 - n
    if pad:
        # Sentinel pad contributes exactly zero (target=2 -> neither pos nor
        # neg; pred=0.5 keeps logs finite).  Only hit for ragged sizes.
        p = jnp.concatenate([p, jnp.full((pad,), 0.5, p.dtype)])
        t = jnp.concatenate([t, jnp.full((pad,), 2.0, t.dtype)])
    p2 = p.reshape(rows, 128)
    t2 = t.reshape(rows, 128)

    kernel = functools.partial(_focal_kernel, tile_rows=tile_rows)
    partials = pl.pallas_call(
        kernel,
        out_shape=jax.ShapeDtypeStruct((n_split, 8, 128), jnp.float32),
        grid=(n_split, steps),
        in_specs=[
            pl.BlockSpec((tile_rows, 128), lambda c, i: (c * steps + i, 0)),
            pl.BlockSpec((tile_rows, 128), lambda c, i: (c * steps + i, 0)),
        ],
        out_specs=pl.BlockSpec((1, 8, 128), lambda c, i: (c, 0, 0)),
        scratch_shapes=[
            pltpu.VMEM((8, 128), jnp.float32),   # merged loss partials
            pltpu.VMEM((8, 128), jnp.float32),   # num_pos partials
        ],
        compiler_params=pltpu.CompilerParams(
            dimension_semantics=("parallel", "arbitrary"),
            vmem_limit_bytes=32 * 1024 * 1024),
    )(p2, t2)

    loss_sum = jnp.sum(partials[:, 0, 0])
    num_pos = jnp.sum(partials[:, 0, 1])
    # pos_sum == 0 whenever num_pos == 0, so this matches the reference branch.
    return -loss_sum / jnp.maximum(num_pos, 1.0)


# ----------------------------------------------------------------------------
# Kernel 2: fused (wh + reg) gather_feature + masked L1, two-stage gather
# ----------------------------------------------------------------------------
def _reg_l1_fused_kernel(pred_ref, target_ref, index_ref, mask_ref, out_ref,
                         acc_ref, *, r_tile, c_wh, c_reg, c_tot):
    h = pl.program_id(0)

    @pl.when(h == 0)
    def _init():
        acc_ref[...] = jnp.zeros_like(acc_ref)

    pred = pred_ref[...].astype(jnp.float32)        # [B, r_tile, Ctot*128]
    idx = index_ref[...]                            # [B, K] int32
    b, k = idx.shape

    # Stage 1: row one-hot over idx // 128, contracted on the MXU.
    idx_row = jax.lax.shift_right_logical(idx, 7)   # idx // 128
    r_iota = jax.lax.broadcasted_iota(jnp.int32, (b, k, r_tile), 2)
    row_oh = (idx_row[:, :, None] == h * r_tile + r_iota).astype(jnp.float32)

    # acc[b, k, c*128 + l] += sum_r row_oh[b,k,r] * pred[b, r, c*128 + l]
    acc_ref[...] += jnp.einsum('bkr,brn->bkn', row_oh, pred,
                               preferred_element_type=jnp.float32)

    @pl.when(h == pl.num_programs(0) - 1)
    def _finalize():
        # Stage 2: lane select over idx % 128, then masked L1 sums.
        idx_col = jnp.bitwise_and(idx, 127)
        lane = jax.lax.broadcasted_iota(jnp.int32, (b, k, 128), 2)
        col_oh = (idx_col[:, :, None] == lane).astype(jnp.float32)  # [B,K,128]

        m = mask_ref[...]                                # [B, K] f32
        tgt = target_ref[...].astype(jnp.float32)        # [B, Ctot, K]
        acc = acc_ref[...]                               # [B, K, Ctot*128]
        msum = jnp.sum(m)

        wh_sum = jnp.float32(0.0)
        reg_sum = jnp.float32(0.0)
        for c in range(c_tot):                           # Ctot is tiny (4)
            g_c = jnp.sum(acc[:, :, c * 128:(c + 1) * 128] * col_oh, axis=-1)
            d_c = jnp.sum(jnp.abs(g_c * m - tgt[:, c, :] * m))
            if c < c_wh:
                wh_sum = wh_sum + d_c
            else:
                reg_sum = reg_sum + d_c

        out_ref[0] = wh_sum / (msum * jnp.float32(c_wh) + 0.0001)
        out_ref[1] = reg_sum / (msum * jnp.float32(c_reg) + 0.0001)


def fused_reg_l1_loss(pred_wh, pred_reg, target_wh, target_reg, index, mask,
                      *, r_tile_max=64):
    """Returns (wh_loss, reg_loss) scalars from one fused kernel."""
    B, c_wh, H, W = pred_wh.shape
    c_reg = pred_reg.shape[1]
    K = index.shape[1]
    HW = H * W
    c_tot = c_wh + c_reg

    # Lane-dense relayout of pred (single XLA copy outside the kernel):
    #   [B, Ctot, HW] -> [B, HW/128, Ctot*128],  element (b, r, c*128+l)
    #   holds pred[b, c, r*128 + l].
    pred = jnp.concatenate(
        [pred_wh.reshape(B, c_wh, HW), pred_reg.reshape(B, c_reg, HW)], axis=1)
    hw_pad = (-HW) % 128
    if hw_pad:
        pred = jnp.pad(pred, ((0, 0), (0, 0), (0, hw_pad)))
    r_total = (HW + hw_pad) // 128
    pred_r = pred.reshape(B, c_tot, r_total, 128).transpose(0, 2, 1, 3)
    pred_r = pred_r.reshape(B, r_total, c_tot * 128)

    r_tile = min(r_tile_max, r_total)
    r_pad = (-r_total) % r_tile
    if r_pad:   # zero rows are never selected (idx < HW) -> exact.
        pred_r = jnp.pad(pred_r, ((0, 0), (0, r_pad), (0, 0)))
    grid = (r_total + r_pad) // r_tile

    tgt = jnp.concatenate([target_wh, target_reg], axis=-1)   # [B, K, Ctot]
    tgt = jnp.swapaxes(tgt, 1, 2)                             # [B, Ctot, K]
    idx = index.astype(jnp.int32)
    msk = mask.astype(jnp.float32)

    kernel = functools.partial(_reg_l1_fused_kernel, r_tile=r_tile,
                               c_wh=c_wh, c_reg=c_reg, c_tot=c_tot)
    out = pl.pallas_call(
        kernel,
        out_shape=jax.ShapeDtypeStruct((2,), jnp.float32),
        grid=(grid,),
        in_specs=[
            pl.BlockSpec((B, r_tile, c_tot * 128), lambda h: (0, h, 0)),
            pl.BlockSpec((B, c_tot, K), lambda h: (0, 0, 0)),
            pl.BlockSpec((B, K), lambda h: (0, 0)),
            pl.BlockSpec((B, K), lambda h: (0, 0)),
        ],
        out_specs=pl.BlockSpec(memory_space=pltpu.MemorySpace.SMEM),
        scratch_shapes=[pltpu.VMEM((B, K, c_tot * 128), jnp.float32)],
        compiler_params=pltpu.CompilerParams(
            dimension_semantics=("arbitrary",),
            vmem_limit_bytes=32 * 1024 * 1024),
    )(pred_r, tgt, idx, msk)
    return out[0], out[1]


# ----------------------------------------------------------------------------
# DetLoss module equivalent
# ----------------------------------------------------------------------------
class DetLoss:
    """Total loss for the object detection task (Pallas/TPU implementation)."""

    def __init__(self, weights):
        self.weights = weights

    def __call__(self, pred, target):
        cls_loss = heatmap_variant_focal_loss(pred["cls"], target["heat_map"])
        wh_loss, reg_loss = fused_reg_l1_loss(
            pred["wh"], pred["reg"], target["wh"], target["reg"],
            target["index"], target["mask"])
        w = self.weights
        return cls_loss * w[0] + wh_loss * w[1] + reg_loss * w[2]


# ----------------------------------------------------------------------------
# Pure-JAX reference (for correctness check only)
# ----------------------------------------------------------------------------
def _ref_total_loss(pred, target, weights):
    p = jnp.maximum(pred["cls"].astype(jnp.float32), 1e-12)
    t = target["heat_map"].astype(jnp.float32)
    pos = (t == 1.0).astype(jnp.float32)
    neg = (t < 1.0).astype(jnp.float32)
    pos_loss = (1.0 - p) ** 2 * jnp.log(p) * pos
    neg_loss = (1.0 - t) ** 4 * p ** 2 * jnp.log(1.0 - p) * neg
    num_pos = pos.sum()
    cls = jnp.where(num_pos == 0.0, -neg_loss.sum(),
                    -(pos_loss.sum() + neg_loss.sum())
                    / jnp.where(num_pos == 0.0, 1.0, num_pos))

    def rl1(pr, tg, idx, msk):
        B, C, H, W = pr.shape
        prf = pr.reshape(B, C, H * W).transpose(0, 2, 1)            # [B,HW,C]
        g = jnp.take_along_axis(prf, idx[:, :, None], axis=1)       # [B,K,C]
        m = msk[:, :, None].astype(jnp.float32)
        num = jnp.abs(g * m - tg * m).sum()
        return num / (m.sum() * C + 0.0001)

    wh = rl1(pred["wh"], target["wh"], target["index"], target["mask"])
    rg = rl1(pred["reg"], target["reg"], target["index"], target["mask"])
    return cls * weights[0] + wh * weights[1] + rg * weights[2]


if __name__ == "__main__":
    B, C, H, W, K = 2, 4, 16, 16, 8

    key = jax.random.PRNGKey(0)
    k1, k2, k3, k4, k5, k6, k7 = jax.random.split(key, 7)

    # Predictions (cls through sigmoid so logs are finite, as in CenterNet).
    pred = {
        "cls": jax.nn.sigmoid(jax.random.normal(k1, (B, C, H, W), jnp.float32)),
        "wh": jax.random.normal(k2, (B, 2, H, W), jnp.float32),
        "reg": jax.random.normal(k3, (B, 2, H, W), jnp.float32) * 0.1,
    }

    # Ground truth: heatmap in [0, 1) with a few exact-1 peaks.
    heat = jax.random.uniform(k4, (B, C, H, W), jnp.float32) * 0.9
    heat = heat.at[0, 0, 3, 5].set(1.0)
    heat = heat.at[0, 1, 10, 12].set(1.0)
    heat = heat.at[1, 2, 7, 9].set(1.0)

    target = {
        "heat_map": heat,
        "wh": jax.random.uniform(k5, (B, K, 2), jnp.float32) * 10.0,
        "reg": jax.random.uniform(k6, (B, K, 2), jnp.float32),
        "index": jax.random.randint(k7, (B, K), 0, H * W, jnp.int32),
        "mask": jnp.array([[1, 1, 1, 0, 0, 0, 0, 0],
                           [1, 1, 0, 0, 0, 0, 0, 0]], dtype=jnp.float32),
    }

    weights = (1.0, 0.1, 1.0)
    det_loss = DetLoss(weights=weights)
    loss = det_loss(pred, target)
    jax.block_until_ready(loss)

    ref = _ref_total_loss(pred, target, weights)
    jax.block_until_ready(ref)

    assert jnp.isfinite(loss), f"non-finite loss: {loss}"
    assert jnp.allclose(loss, ref, rtol=2e-2, atol=2e-2), (
        f"mismatch: pallas={loss} ref={ref}")
    print("KERNEL_OK")
</pallas_src>

<mosaic_0001>
module attributes {stable_mosaic.version = 11 : i64} {
  func.func @_focal_kernel(%arg0: i32, %arg1: i32, %arg2: memref<16x128xf32, #tpu.memory_space<vmem>>, %arg3: memref<16x128xf32, #tpu.memory_space<vmem>>, %arg4: memref<1x8x128xf32, #tpu.memory_space<vmem>>, %arg5: memref<8x128xf32, #tpu.memory_space<vmem>>, %arg6: memref<8x128xf32, #tpu.memory_space<vmem>>) attributes {dimension_semantics = [#tpu.dimension_semantics<parallel>, #tpu.dimension_semantics<arbitrary>], iteration_bounds = array<i64: 1, 1>, scalar_prefetch = 0 : i64, scratch_operands = 2 : i64, tpu.core_type = #tpu.core_type<tc>, window_params = [{transform_indices = @transform_0, window_bounds = array<i64: 16, 128>}, {transform_indices = @transform_1, window_bounds = array<i64: 16, 128>}, {transform_indices = @transform_2, window_bounds = array<i64: 1, 8, 128>}]} {
    %c0_i32 = arith.constant 0 : i32
    %0 = arith.cmpi eq, %arg1, %c0_i32 : i32
    %1 = arith.extui %0 : i1 to i32
    %c0_i32_0 = arith.constant 0 : i32
    %2 = arith.cmpi ne, %1, %c0_i32_0 : i32
    scf.if %2 {
      %cst_22 = arith.constant 0.000000e+00 : f32
      %44 = vector.broadcast %cst_22 : f32 to vector<8x128xf32>
      %c0_23 = arith.constant 0 : index
      %c0_24 = arith.constant 0 : index
      %45 = vector.load %arg5[%c0_23, %c0_24] : memref<8x128xf32, #tpu.memory_space<vmem>>, vector<8x128xf32>
      tpu.vector_store %arg5[%c0_23, %c0_24], %44 {strides = array<i32>} : memref<8x128xf32, #tpu.memory_space<vmem>>, vector<8x128xf32>,
      %cst_25 = arith.constant 0.000000e+00 : f32
      %46 = vector.broadcast %cst_25 : f32 to vector<8x128xf32>
      %c0_26 = arith.constant 0 : index
      %c0_27 = arith.constant 0 : index
      %47 = vector.load %arg6[%c0_26, %c0_27] : memref<8x128xf32, #tpu.memory_space<vmem>>, vector<8x128xf32>
      tpu.vector_store %arg6[%c0_26, %c0_27], %46 {strides = array<i32>} : memref<8x128xf32, #tpu.memory_space<vmem>>, vector<8x128xf32>,
    } else {
    }
    %c0 = arith.constant 0 : index
    %c0_1 = arith.constant 0 : index
    %3 = vector.load %arg2[%c0, %c0_1] : memref<16x128xf32, #tpu.memory_space<vmem>>, vector<16x128xf32>
    %c0_2 = arith.constant 0 : index
    %c0_3 = arith.constant 0 : index
    %4 = vector.load %arg3[%c0_2, %c0_3] : memref<16x128xf32, #tpu.memory_space<vmem>>, vector<16x128xf32>
    %cst = arith.constant 9.99999996E-13 : f32
    %5 = vector.broadcast %cst : f32 to vector<16x128xf32>
    %6 = arith.maximumf %3, %5 : vector<16x128xf32>
    %cst_4 = arith.constant 1.000000e+00 : f32
    %7 = vector.broadcast %cst_4 : f32 to vector<16x128xf32>
    %8 = arith.subf %7, %6 : vector<16x128xf32>
    %9 = math.log %6 : vector<16x128xf32>
    %cst_5 = arith.constant 9.99999996E-13 : f32
    %10 = vector.broadcast %cst_5 : f32 to vector<16x128xf32>
    %11 = arith.maximumf %8, %10 : vector<16x128xf32>
    %12 = math.log %11 : vector<16x128xf32>
    %cst_6 = arith.constant 1.000000e+00 : f32
    %13 = vector.broadcast %cst_6 : f32 to vector<16x128xf32>
    %14 = arith.subf %13, %4 : vector<16x128xf32>
    %15 = arith.mulf %14, %14 : vector<16x128xf32>
    %cst_7 = arith.constant 1.000000e+00 : f32
    %16 = vector.broadcast %cst_7 : f32 to vector<16x128xf32>
    %17 = arith.cmpf oeq, %4, %16 : vector<16x128xf32>
    %18 = arith.mulf %8, %8 : vector<16x128xf32>
    %19 = arith.mulf %18, %9 : vector<16x128xf32>
    %20 = arith.mulf %15, %15 : vector<16x128xf32>
    %21 = arith.mulf %6, %6 : vector<16x128xf32>
    %22 = arith.mulf %20, %21 : vector<16x128xf32>
    %23 = arith.mulf %22, %12 : vector<16x128xf32>
    %cst_8 = arith.constant 1.000000e+00 : f32
    %24 = vector.broadcast %cst_8 : f32 to vector<16x128xf32>
    %25 = arith.cmpf olt, %4, %24 : vector<16x128xf32>
    %cst_9 = arith.constant 0.000000e+00 : f32
    %26 = vector.broadcast %cst_9 : f32 to vector<16x128xf32>
    %27 = arith.select %25, %23, %26 : vector<16x128xi1>, vector<16x128xf32>
    %28 = arith.select %17, %19, %27 : vector<16x128xi1>, vector<16x128xf32>
    %c0_10 = arith.constant 0 : index
    %c0_11 = arith.constant 0 : index
    %29 = vector.load %arg5[%c0_10, %c0_11] : memref<8x128xf32, #tpu.memory_space<vmem>>, vector<8x128xf32>
    %30 = vector.shape_cast %28 : vector<16x128xf32> to vector<2x8x128xf32>
    %cst_12 = arith.constant dense<0.000000e+00> : vector<8x128xf32>
    %31 = vector.multi_reduction <add>, %30, %cst_12 [0] : vector<2x8x128xf32> to vector<8x128xf32>
    %32 = arith.addf %29, %31 : vector<8x128xf32>
    %c0_13 = arith.constant 0 : index
    %c0_14 = arith.constant 0 : index
    %33 = vector.load %arg5[%c0_13, %c0_14] : memref<8x128xf32, #tpu.memory_space<vmem>>, vector<8x128xf32>
    tpu.vector_store %arg5[%c0_13, %c0_14], %32 {strides = array<i32>} : memref<8x128xf32, #tpu.memory_space<vmem>>, vector<8x128xf32>,
    %c0_15 = arith.constant 0 : index
    %c0_16 = arith.constant 0 : index
    %34 = vector.load %arg6[%c0_15, %c0_16] : memref<8x128xf32, #tpu.memory_space<vmem>>, vector<8x128xf32>
    %35 = arith.extui %17 : vector<16x128xi1> to vector<16x128xi32>
    %36 = arith.sitofp %35 : vector<16x128xi32> to vector<16x128xf32>
    %37 = vector.shape_cast %36 : vector<16x128xf32> to vector<2x8x128xf32>
    %cst_17 = arith.constant dense<0.000000e+00> : vector<8x128xf32>
    %38 = vector.multi_reduction <add>, %37, %cst_17 [0] : vector<2x8x128xf32> to vector<8x128xf32>
    %39 = arith.addf %34, %38 : vector<8x128xf32>
    %c0_18 = arith.constant 0 : index
    %c0_19 = arith.constant 0 : index
    %40 = vector.load %arg6[%c0_18, %c0_19] : memref<8x128xf32, #tpu.memory_space<vmem>>, vector<8x128xf32>
    tpu.vector_store %arg6[%c0_18, %c0_19], %39 {strides = array<i32>} : memref<8x128xf32, #tpu.memory_space<vmem>>, vector<8x128xf32>,
    %c0_i32_20 = arith.constant 0 : i32
    %41 = arith.cmpi eq, %arg1, %c0_i32_20 : i32
    %42 = arith.extui %41 : i1 to i32
    %c0_i32_21 = arith.constant 0 : i32
    %43 = arith.cmpi ne, %42, %c0_i32_21 : i32
    scf.if %43 {
      %c0_22 = arith.constant 0 : index
      %c0_23 = arith.constant 0 : index
      %44 = vector.load %arg5[%c0_22, %c0_23] : memref<8x128xf32, #tpu.memory_space<vmem>>, vector<8x128xf32>
      %45 = vector.shape_cast %44 : vector<8x128xf32> to vector<1x8x128xf32>
      %cst_24 = arith.constant dense<0.000000e+00> : vector<1xf32>
      %46 = vector.multi_reduction <add>, %45, %cst_24 [1, 2] : vector<1x8x128xf32> to vector<1xf32>
      %47 = vector.shape_cast %46 : vector<1xf32> to vector<1x1x1xf32>
      %48 = vector.extract %47[0, 0, 0] : f32 from vector<1x1x1xf32>
      %c0_25 = arith.constant 0 : index
      %c0_26 = arith.constant 0 : index
      %49 = vector.load %arg6[%c0_25, %c0_26] : memref<8x128xf32, #tpu.memory_space<vmem>>, vector<8x128xf32>
      %50 = vector.shape_cast %49 : vector<8x128xf32> to vector<1x8x128xf32>
      %cst_27 = arith.constant dense<0.000000e+00> : vector<1xf32>
      %51 = vector.multi_reduction <add>, %50, %cst_27 [1, 2] : vector<1x8x128xf32> to vector<1xf32>
      %52 = vector.shape_cast %51 : vector<1xf32> to vector<1x1x1xf32>
      %53 = vector.extract %52[0, 0, 0] : f32 from vector<1x1x1xf32>
      %54 = tpu.iota {dimensions = array<i32: 1>} : vector<1x8x128xi32>
      %55 = tpu.iota {dimensions = array<i32: 2>} : vector<1x8x128xi32>
      %c0_i32_28 = arith.constant 0 : i32
      %56 = vector.broadcast %c0_i32_28 : i32 to vector<1x8x128xi32>
      %57 = arith.cmpi eq, %54, %56 : vector<1x8x128xi32>
      %c0_i32_29 = arith.constant 0 : i32
      %58 = vector.broadcast %c0_i32_29 : i32 to vector<1x8x128xi32>
      %59 = arith.cmpi eq, %55, %58 : vector<1x8x128xi32>
      %60 = arith.andi %57, %59 : vector<1x8x128xi1>
      %c1_i32 = arith.constant 1 : i32
      %61 = vector.broadcast %c1_i32 : i32 to vector<1x8x128xi32>
      %62 = arith.cmpi eq, %55, %61 : vector<1x8x128xi32>
      %63 = arith.andi %57, %62 : vector<1x8x128xi1>
      %cst_30 = arith.constant 0.000000e+00 : f32
      %64 = vector.broadcast %53 : f32 to vector<1x8x128xf32>
      %65 = vector.broadcast %cst_30 : f32 to vector<1x8x128xf32>
      %66 = arith.select %63, %64, %65 : vector<1x8x128xi1>, vector<1x8x128xf32>
      %67 = vector.broadcast %48 : f32 to vector<1x8x128xf32>
      %68 = arith.select %60, %67, %66 : vector<1x8x128xi1>, vector<1x8x128xf32>
      %c0_31 = arith.constant 0 : index
      %c0_32 = arith.constant 0 : index
      %c0_33 = arith.constant 0 : index
      %69 = vector.load %arg4[%c0_31, %c0_32, %c0_33] : memref<1x8x128xf32, #tpu.memory_space<vmem>>, vector<1x8x128xf32>
      tpu.vector_store %arg4[%c0_31, %c0_32, %c0_33], %68 {strides = array<i32>} : memref<1x8x128xf32, #tpu.memory_space<vmem>>, vector<1x8x128xf32>,
    } else {
    }
    return
  }
  func.func @transform_0(%arg0: i32, %arg1: i32) -> (i32, i32) {
    %c1_i32 = arith.constant 1 : i32
    %0 = arith.muli %arg0, %c1_i32 : i32
    %1 = arith.addi %0, %arg1 : i32
    %c0_i32 = arith.constant 0 : i32
    %c0_i32_0 = arith.constant 0 : i32
    return %1, %c0_i32 : i32, i32
  }
  func.func @transform_1(%arg0: i32, %arg1: i32) -> (i32, i32) {
    %c1_i32 = arith.constant 1 : i32
    %0 = arith.muli %arg0, %c1_i32 : i32
    %1 = arith.addi %0, %arg1 : i32
    %c0_i32 = arith.constant 0 : i32
    %c0_i32_0 = arith.constant 0 : i32
    return %1, %c0_i32 : i32, i32
  }
  func.func @transform_2(%arg0: i32, %arg1: i32) -> (i32, i32, i32) {
    %c0_i32 = arith.constant 0 : i32
    %c0_i32_0 = arith.constant 0 : i32
    %c0_i32_1 = arith.constant 0 : i32
    return %arg0, %c0_i32, %c0_i32_0 : i32, i32, i32
  }
}

</mosaic_0001>

<bundles_post_ra>
// kernel: tpu_custom_call.1
= control target key start
LH: loop header
LB: loop body
LE: loop exit
PB: predicated region body
PF: predicated region fallthrough
CT: control target
= control target key end

     0   :  { %7 = vsyncpa [#allocation5], 0  ;;  %s299_s0 = inlined_call_operand.hbm [shape: f32[16,128], index: 0, kind: input, shape index: {}]   ;;  %s300_s1 = inlined_call_operand.hbm [shape: f32[16,128], index: 1, kind: input, shape index: {}]   ;;  %s301_s2 = inlined_call_operand.hbm [shape: f32[1,8,128], index: 2, kind: output, shape index: {}]  }
   0x1   :  { %8 = vsyncpa [#allocation8], 0 }
   0x2   :  { %9 = vsyncpa [#allocation6], 0  ;;  %s18_s11 = sshll.u32 %s299_s0, 4  ;;  %s269_s12 = smov [#allocation4]   ;;  %s19_s11 = int_to_ptr.hbm [resolvable:$true] %s18_s11 }
   0x3   :  { %s20_s13 = sshll.u32 %s269_s12, 4  ;;  %s35_s16 = sshll.u32 %s300_s1, 4  ;;  %s21_s13 = int_to_ptr.vmem [resolvable:$true] %s20_s13  ;;  %s36_s16 = int_to_ptr.hbm [resolvable:$true] %s35_s16 }
   0x4   :  { %s270_s17 = smov 128   ;;  %s271_s18 = smov 8  }
   0x5   :  { %26 = dma.hbm_to_vmem [thread:$0]  %s19_s11, 256, %s21_s13, [#allocation5], %s270_s17, %s270_s17, %s271_s18  }
   0x6   :  { %s272_s19 = smov [#allocation7]  }
   0x7   :  { %s37_s20 = sshll.u32 %s272_s19, 4  ;;  %s38_s20 = int_to_ptr.vmem [resolvable:$true] %s37_s20 }
   0x8   :  { %43 = dma.hbm_to_vmem [thread:$0]  %s36_s16, 256, %s38_s20, [#allocation8], %s270_s17, %s270_s17, %s271_s18  }
   0x9   :  { %263 = dma.done.wait [#allocation5], 256  }
   0xa   :  { %264 = vsyncadd [#allocation5], 4294967040 }
   0xb   :  { %265 = dma.done.wait [#allocation8], 256  }
   0xc   :  { %266 = vsyncadd [#allocation8], 4294967040  ;;  %v62_v0 = vld [vmem:[#allocation4] sm:$0xff]  ;;  %v63_v1 = vld [vmem:[#allocation4 + $0x8] sm:$0xff]  ;;  %v273_v39 = vmov 0.0   ;;  %v139_v57 = vlaneseq  ;;  %s274_s0 = smov [#allocation9]  }
   0xd   :  { %v64_v2 = vld [vmem:[#allocation7] sm:$0xff]  ;;  %v65_v3 = vld [vmem:[#allocation7 + $0x8] sm:$0xff]  ;;  %v66_v4 = vmax.f32 %v62_v0, 1e-12  ;;  %v67_v5 = vmax.f32 %v63_v1, 1e-12 }
   0xe   :  { %v80_v6 = vsub.f32 1.0, %v64_v2  ;;  %v81_v7 = vsub.f32 1.0, %v65_v3  ;;  %vm98_vm0 = vcmp.lt.f32.partialorder %v64_v2, 1.0  ;;  %vm84_vm1 = vcmp.eq.f32.partialorder %v64_v2, 1.0  ;;  %s158_s1 = sshll.u32 %s274_s0, 4  ;;  %s160_s24 = sshll.u32 %s301_s2, 4  ;;  %s159_s1 = int_to_ptr.vmem [resolvable:$true] %s158_s1  ;;  %s161_s24 = int_to_ptr.hbm [resolvable:$true] %s160_s24 }
   0xf   :  { %v68_v8 = vsub.f32 1.0, %v66_v4  ;;  %v69_v9 = vsub.f32 1.0, %v67_v5  ;;  %183 = vlog2.f32 %v66_v4  ;;  %v92_v15 = vmul.f32 %v66_v4, %v66_v4 }
  0x10   :  { %185 = vlog2.f32 %v67_v5  ;;  %v82_v10 = vmul.f32 %v80_v6, %v80_v6  ;;  %v83_v13 = vmul.f32 %v81_v7, %v81_v7  ;;  %v93_v18 = vmul.f32 %v67_v5, %v67_v5 }
  0x11   :  { %v74_v11 = vmax.f32 %v68_v8, 1e-12  ;;  %v75_v12 = vmax.f32 %v69_v9, 1e-12  ;;  %v86_v21 = vmul.f32 %v68_v8, %v68_v8  ;;  %v87_v23 = vmul.f32 %v69_v9, %v69_v9 }
  0x12   :  { %v90_v14 = vmul.f32 %v82_v10, %v82_v10  ;;  %v91_v17 = vmul.f32 %v83_v13, %v83_v13  ;;  %vm99_vm2 = vcmp.lt.f32.partialorder %v65_v3, 1.0  ;;  %vm85_vm3 = vcmp.eq.f32.partialorder %v65_v3, 1.0 }
  0x13   :  { %187 = vlog2.f32 %v74_v11  ;;  %v171_v40 = vsel %vm84_vm1, 1.0, %v273_v39  ;;  %v172_v41 = vsel %vm85_vm3, 1.0, %v273_v39  ;;  %v140_v58 = vshrl.u32 %v139_v57, 7 }
  0x14   :  { %189 = vlog2.f32 %v75_v12  ;;  %v94_v24 = vmul.f32 %v92_v15, %v90_v14  ;;  %v95_v26 = vmul.f32 %v93_v18, %v91_v17  ;;  %v113_v42 = vadd.f32 %v172_v41, %v171_v40 }
  0x15   :  { %v184_v16 = vpop.eup %183  ;;  %v142_v59 = vand.u32 127, %v139_v57  ;;  %vm143_vm4 = vcmp.eq.s32.totalorder %v140_v58, 0 }
  0x16   :  { %v186_v19 = vpop.eup %185  ;;  %v71_v20 = vmul.f32 0.6931472, %v184_v16 }
  0x17   :  { %v73_v22 = vmul.f32 0.6931472, %v186_v19  ;;  %vm146_vm5 = vcmp.eq.s32.totalorder %v142_v59, 1  ;;  %vm144_vm6 = vcmp.eq.s32.totalorder %v142_v59, 0 }
  0x18   :  { %v88_v30 = vmul.f32 %v86_v21, %v71_v20  ;;  %vm147_vm7 = vmand %vm143_vm4, %vm146_vm5 }
  0x19   :  { %v188_v25 = vpop.eup %187  ;;  %v89_v31 = vmul.f32 %v87_v23, %v73_v22  ;;  %vm145_vm8 = vmand %vm143_vm4, %vm144_vm6 }
  0x1a   :  { %v190_v27 = vpop.eup %189  ;;  %v77_v28 = vmul.f32 0.6931472, %v188_v25 }
  0x1b   :  { %v79_v29 = vmul.f32 0.6931472, %v190_v27 }
  0x1c   :  { %v96_v32 = vmul.f32 %v94_v24, %v77_v28 }
  0x1d   :  { %v97_v33 = vmul.f32 %v95_v26, %v79_v29 }
  0x1e   :  { %v100_v34 = vsel %vm98_vm0, %v96_v32, 0.0 }
  0x1f   :  { %v101_v35 = vsel %vm99_vm2, %v97_v33, 0.0  ;;  %v102_v36 = vsel %vm84_vm1, %v88_v30, %v100_v34 }
  0x20   :  { %v103_v37 = vsel %vm85_vm3, %v89_v31, %v101_v35 }
  0x21   :  { %v105_v38 = vadd.f32 %v103_v37, %v102_v36 }
  0x23   :  { %120 = vadd.xlane.f32.xlu0 %v105_v38 }
  0x2b   :  { %130 = vadd.xlane.f32.xlu0 %v113_v42 }
  0x96   :  { %v121_v43 = vpop.xlane.xlu0 %120 }
  0x97   :  { %v122_v44 = vrot.slane %v121_v43, 4 }
  0x99   :  { %v123_v45 = vadd.f32 %v122_v44, %v121_v43 }
  0x9b   :  { %v124_v46 = vrot.slane %v123_v45, 2 }
  0x9d   :  { %v125_v47 = vadd.f32 %v124_v46, %v123_v45 }
  0x9e   :  { %v131_v48 = vpop.xlane.xlu0 %130 }
  0x9f   :  { %v132_v49 = vrot.slane %v131_v48, 4  ;;  %v126_v50 = vrot.slane %v125_v47, 1 }
  0xa1   :  { %v133_v51 = vadd.f32 %v132_v49, %v131_v48  ;;  %v127_v52 = vadd.f32 %v126_v50, %v125_v47 }
  0xa3   :  { %v134_v53 = vrot.slane %v133_v51, 2  ;;  %173 = vpush %v127_v52 }
  0xa5   :  { %v135_v54 = vadd.f32 %v134_v53, %v133_v51 }
  0xa7   :  { %v136_v55 = vrot.slane %v135_v54, 1 }
  0xa9   :  { %v137_v56 = vadd.f32 %v136_v55, %v135_v54 }
  0xab   :  { %175 = vpush %v137_v56 }
  0xd4   :  { %s174_s21 = spop %173 }
  0xd5   :  { %v150_v61 = vstv %s174_s21 }
  0xdc   :  { %s176_s25 = spop %175 }
  0xdd   :  { %v148_v60 = vstv %s176_s25 }
  0xde   :  { %v149_v62 = vsel %vm147_vm7, %v148_v60, 0.0 }
  0xdf   :  { %v151_v63 = vsel %vm145_vm8, %v150_v61, %v149_v62 }
  0xe0   :  { %152 = vst [vmem:[#allocation9] sm:$0xff] %v151_v63 }
  0xe1   :  { %163 = dma.vmem_to_hbm [thread:$0]  %s159_s1, 128, %s161_s24, [#allocation6]  }
  0xe2   :  { %267 = dma.done.wait [#allocation6], 128  }
  0xe3   :  { %268 = vsyncadd [#allocation6], 4294967168 }
  0xe4   :  { %168 = vsyncpa [#allocation5], 1 }
  0xe5   :  { %169 = vsyncpa [#allocation8], 1 }
  0xe6   :  { %170 = vsyncpa [#allocation6], 1 }

</bundles_post_ra>
